<compile_context>
chip_gen: v5e
topology: v5e:2x2
jax: 0.10.0
libtpu: 0.0.40
codegen_flags: <defaults>
</compile_context>

<pallas_src>
import functools

import jax
import jax.numpy as jnp
from jax.experimental import pallas as pl
from jax.experimental.pallas import tpu as pltpu


# ----------------------------- Fused Pallas kernel ------------------------- #

def _make_decoder_kernel(num_layers, hidden_size):
    """Builds the fused single-step decoder kernel for a fixed layer count."""
    L, H = num_layers, hidden_size

    def kernel(*refs):
        # ref layout:
        #   tok_ref  : (N, 1)   int32   token ids
        #   emb_ref  : (V, E)   f32     embedding table
        #   per layer l: wcat_l (E_l+H, 4H), b_l (1, 4H)   [gate order i,f,g,o]
        #   h_ref    : (L, N, H) f32    previous hidden
        #   c_ref    : (L, N, H) f32    previous cell
        #   fcw_ref  : (H, O)   f32     fc weight (pre-transposed)
        #   fcb_ref  : (1, O)   f32     fc bias
        # outputs:
        #   pred_ref : (N, O)
        #   hc_ref   : (N, 2*L*H)  [h_0 | .. | h_{L-1} | c_0 | .. | c_{L-1}]
        tok_ref, emb_ref = refs[0], refs[1]
        layer_refs = refs[2:2 + 2 * L]
        h_ref, c_ref, fcw_ref, fcb_ref = refs[2 + 2 * L: 6 + 2 * L]
        pred_ref, hc_ref = refs[6 + 2 * L], refs[7 + 2 * L]

        N = tok_ref.shape[0]
        V = emb_ref.shape[0]

        # ---- embedding gather fused as one-hot matmul (V small, MXU idle) ----
        tok = tok_ref[...]                                   # (N, 1) int32
        onehot = (jax.lax.broadcasted_iota(jnp.int32, (N, V), 1)
                  == tok).astype(jnp.float32)                # (N, V)
        x = jnp.dot(onehot, emb_ref[...],
                    preferred_element_type=jnp.float32)      # (N, E)
        # dropout(embedding): identity (eval mode)

        h_list, c_list = [], []
        for l in range(L):
            wcat = layer_refs[2 * l][...]                    # (E_l + H, 4H)
            b = layer_refs[2 * l + 1][...]                   # (1, 4H)
            h_prev = h_ref[l]                                # (N, H)
            c_prev = c_ref[l]                                # (N, H)

            # single merged matmul: [x, h] @ [W_ih; W_hh]
            xh = jnp.concatenate([x, h_prev], axis=-1)       # (N, E_l + H)
            gates = (jnp.dot(xh, wcat, preferred_element_type=jnp.float32)
                     + b)                                    # (N, 4H)

            # two full-width transcendental passes, then static lane slices
            s = jax.nn.sigmoid(gates)
            t = jnp.tanh(gates)
            i_g = s[:, 0 * H:1 * H]
            f_g = s[:, 1 * H:2 * H]
            g_g = t[:, 2 * H:3 * H]
            o_g = s[:, 3 * H:4 * H]

            c_new = f_g * c_prev + i_g * g_g
            h_new = o_g * jnp.tanh(c_new)

            h_list.append(h_new)
            c_list.append(c_new)
            x = h_new                    # inter-layer dropout: identity (eval)

        # single lane-dense store of the full new state slab
        hc_ref[...] = jnp.concatenate(h_list + c_list, axis=-1).astype(hc_ref.dtype)

        # final linear on the top-layer hidden state
        pred_ref[...] = (jnp.dot(x, fcw_ref[...],
                                 preferred_element_type=jnp.float32)
                         + fcb_ref[...]).astype(pred_ref.dtype)

    return kernel


# ------------------------------ Wrappers ----------------------------------- #

def _vmem_spec():
    # Whole-array block resident in VMEM (no tiling; shapes are tiny).
    return pl.BlockSpec(memory_space=pltpu.VMEM)


@jax.jit
def decoder_forward(params, x_tokens, hidden, cell):
    """Mirrors Decoder.forward for a single decode step.

    x_tokens : (N,)               int32 token ids
    hidden   : (num_layers, N, H) float32
    cell     : (num_layers, N, H) float32
    returns  : predictions (N, output_size), hidden, cell
    """
    L, N, H = hidden.shape
    O = params["fc_w_t"].shape[1]

    tok2d = x_tokens.reshape(N, 1).astype(jnp.int32)

    layer_args = []
    for lp in params["lstm"]:
        layer_args += [lp["w_cat"], lp["b"]]

    kernel = _make_decoder_kernel(L, H)
    n_in = 2 + 2 * L + 4

    pred, hc = pl.pallas_call(
        kernel,
        out_shape=(jax.ShapeDtypeStruct((N, O), jnp.float32),
                   jax.ShapeDtypeStruct((N, 2 * L * H), jnp.float32)),
        in_specs=[_vmem_spec()] * n_in,
        out_specs=(_vmem_spec(), _vmem_spec()),
    )(tok2d, params["embedding"], *layer_args, hidden, cell,
      params["fc_w_t"], params["fc_b"])

    # wrapper-side layout plumbing back to PyTorch's (num_layers, N, H)
    h_out = hc[:, :L * H].reshape(N, L, H).transpose(1, 0, 2)
    c_out = hc[:, L * H:].reshape(N, L, H).transpose(1, 0, 2)
    return pred, h_out, c_out


def init_decoder_params(key, input_size, embedding_size, hidden_size,
                        output_size, num_layers):
    """Deterministic synthetic parameters (same shapes as the PyTorch module)."""
    keys = jax.random.split(key, 3 + 4 * num_layers)
    params = {}
    params["embedding"] = jax.random.normal(
        keys[0], (input_size, embedding_size), jnp.float32) * 0.1

    lstm = []
    for layer in range(num_layers):
        in_dim = embedding_size if layer == 0 else hidden_size
        k0, k1, k2, k3 = keys[1 + 4 * layer: 5 + 4 * layer]
        w_ih = jax.random.normal(k0, (4 * hidden_size, in_dim), jnp.float32) * 0.1
        w_hh = jax.random.normal(k1, (4 * hidden_size, hidden_size), jnp.float32) * 0.1
        b_ih = jax.random.normal(k2, (4 * hidden_size,), jnp.float32) * 0.1
        b_hh = jax.random.normal(k3, (4 * hidden_size,), jnp.float32) * 0.1
        lstm.append({
            # pre-transposed and pre-concatenated: [x, h] @ w_cat == x@W_ih.T + h@W_hh.T
            "w_cat": jnp.concatenate([w_ih.T, w_hh.T], axis=0),   # (in_dim+H, 4H)
            "b": (b_ih + b_hh).reshape(1, -1),                    # (1, 4H)
        })
    params["lstm"] = lstm

    kf_w, kf_b = keys[1 + 4 * num_layers], keys[2 + 4 * num_layers]
    fc_w = jax.random.normal(kf_w, (output_size, hidden_size), jnp.float32) * 0.1
    fc_b = jax.random.normal(kf_b, (output_size,), jnp.float32) * 0.1
    params["fc_w_t"] = fc_w.T                                     # (H, O)
    params["fc_b"] = fc_b.reshape(1, -1)                          # (1, O)
    return params


# ------------------------------ Reference ----------------------------------- #

def decoder_forward_ref(params, x_tokens, hidden, cell):
    L, N, H = hidden.shape
    x = params["embedding"][x_tokens]                             # (N, E)
    new_h, new_c = [], []
    for l, lp in enumerate(params["lstm"]):
        in_dim = lp["w_cat"].shape[0] - H
        w_ih_t = lp["w_cat"][:in_dim]
        w_hh_t = lp["w_cat"][in_dim:]
        gates = x @ w_ih_t + hidden[l] @ w_hh_t + lp["b"]
        i = jax.nn.sigmoid(gates[:, :H])
        f = jax.nn.sigmoid(gates[:, H:2 * H])
        g = jnp.tanh(gates[:, 2 * H:3 * H])
        o = jax.nn.sigmoid(gates[:, 3 * H:])
        c_new = f * cell[l] + i * g
        h_new = o * jnp.tanh(c_new)
        new_h.append(h_new)
        new_c.append(c_new)
        x = h_new
    preds = x @ params["fc_w_t"] + params["fc_b"]
    return preds, jnp.stack(new_h), jnp.stack(new_c)


# -------------------------------- Main -------------------------------------- #

if __name__ == "__main__":
    input_size = 64        # vocab
    embedding_size = 32
    hidden_size = 32
    output_size = 64
    num_layers = 2
    N = 8                  # batch

    key = jax.random.PRNGKey(0)
    kp, kx, kh, kc = jax.random.split(key, 4)

    params = init_decoder_params(kp, input_size, embedding_size, hidden_size,
                                 output_size, num_layers)
    x_tokens = jax.random.randint(kx, (N,), 0, input_size, dtype=jnp.int32)
    hidden = jax.random.normal(kh, (num_layers, N, hidden_size), jnp.float32)
    cell = jax.random.normal(kc, (num_layers, N, hidden_size), jnp.float32)

    preds, h_out, c_out = decoder_forward(params, x_tokens, hidden, cell)
    jax.block_until_ready((preds, h_out, c_out))

    preds_r, h_r, c_r = decoder_forward_ref(params, x_tokens, hidden, cell)
    assert preds.shape == (N, output_size)
    assert h_out.shape == (num_layers, N, hidden_size)
    assert c_out.shape == (num_layers, N, hidden_size)
    assert jnp.allclose(preds, preds_r, atol=1e-5)
    assert jnp.allclose(h_out, h_r, atol=1e-5)
    assert jnp.allclose(c_out, c_r, atol=1e-5)

    print("KERNEL_OK")
</pallas_src>

<mosaic_0001>
module attributes {stable_mosaic.version = 11 : i64} {
  func.func @kernel(%arg0: memref<8x1xi32, #tpu.memory_space<vmem>>, %arg1: memref<64x32xf32, #tpu.memory_space<vmem>>, %arg2: memref<64x128xf32, #tpu.memory_space<vmem>>, %arg3: memref<1x128xf32, #tpu.memory_space<vmem>>, %arg4: memref<64x128xf32, #tpu.memory_space<vmem>>, %arg5: memref<1x128xf32, #tpu.memory_space<vmem>>, %arg6: memref<2x8x32xf32, #tpu.memory_space<vmem>>, %arg7: memref<2x8x32xf32, #tpu.memory_space<vmem>>, %arg8: memref<32x64xf32, #tpu.memory_space<vmem>>, %arg9: memref<1x64xf32, #tpu.memory_space<vmem>>, %arg10: memref<8x64xf32, #tpu.memory_space<vmem>>, %arg11: memref<8x128xf32, #tpu.memory_space<vmem>>) attributes {dimension_semantics = [], scalar_prefetch = 0 : i64, scratch_operands = 0 : i64, tpu.core_type = #tpu.core_type<tc>} {
    %c0 = arith.constant 0 : index
    %c0_0 = arith.constant 0 : index
    %0 = vector.load %arg0[%c0, %c0_0] : memref<8x1xi32, #tpu.memory_space<vmem>>, vector<8x1xi32>
    %1 = tpu.iota {dimensions = array<i32: 1>} : vector<8x64xi32>
    %2 = vector.broadcast %0 : vector<8x1xi32> to vector<8x64xi32>
    %3 = arith.cmpi eq, %1, %2 : vector<8x64xi32>
    %4 = arith.extui %3 : vector<8x64xi1> to vector<8x64xi32>
    %5 = arith.sitofp %4 : vector<8x64xi32> to vector<8x64xf32>
    %c0_1 = arith.constant 0 : index
    %c0_2 = arith.constant 0 : index
    %6 = vector.load %arg1[%c0_1, %c0_2] : memref<64x32xf32, #tpu.memory_space<vmem>>, vector<64x32xf32>
    %cst = arith.constant dense<0.000000e+00> : vector<8x32xf32>
    %7 = tpu.matmul %5, %6, %cst {dimension_numbers = #tpu.dot_dimension_numbers<[1], [0], [0], [1], [0, 0, 1, 1], [], []>} : vector<8x64xf32>, vector<64x32xf32>, vector<8x32xf32> -> vector<8x32xf32>
    %c0_3 = arith.constant 0 : index
    %c0_4 = arith.constant 0 : index
    %8 = vector.load %arg2[%c0_3, %c0_4] : memref<64x128xf32, #tpu.memory_space<vmem>>, vector<64x128xf32>
    %c0_5 = arith.constant 0 : index
    %c0_6 = arith.constant 0 : index
    %9 = vector.load %arg3[%c0_5, %c0_6] : memref<1x128xf32, #tpu.memory_space<vmem>>, vector<1x128xf32>
    %c0_7 = arith.constant 0 : index
    %c0_8 = arith.constant 0 : index
    %c0_9 = arith.constant 0 : index
    %10 = vector.load %arg6[%c0_7, %c0_8, %c0_9] : memref<2x8x32xf32, #tpu.memory_space<vmem>>, vector<1x8x32xf32>
    %11 = vector.shape_cast %10 : vector<1x8x32xf32> to vector<8x32xf32>
    %c0_10 = arith.constant 0 : index
    %c0_11 = arith.constant 0 : index
    %c0_12 = arith.constant 0 : index
    %12 = vector.load %arg7[%c0_10, %c0_11, %c0_12] : memref<2x8x32xf32, #tpu.memory_space<vmem>>, vector<1x8x32xf32>
    %13 = vector.shape_cast %12 : vector<1x8x32xf32> to vector<8x32xf32>
    %14 = tpu.concatenate %7, %11 in 1 : vector<8x32xf32>, vector<8x32xf32> -> vector<8x64xf32>
    %cst_13 = arith.constant dense<0.000000e+00> : vector<8x128xf32>
    %15 = tpu.matmul %14, %8, %cst_13 {dimension_numbers = #tpu.dot_dimension_numbers<[1], [0], [0], [1], [0, 0, 1, 1], [], []>} : vector<8x64xf32>, vector<64x128xf32>, vector<8x128xf32> -> vector<8x128xf32>
    %16 = vector.broadcast %9 : vector<1x128xf32> to vector<8x128xf32>
    %17 = arith.addf %15, %16 : vector<8x128xf32>
    %18 = arith.negf %17 : vector<8x128xf32>
    %19 = math.exp %18 : vector<8x128xf32>
    %cst_14 = arith.constant 1.000000e+00 : f32
    %20 = vector.broadcast %cst_14 : f32 to vector<8x128xf32>
    %21 = arith.addf %20, %19 : vector<8x128xf32>
    %22 = arith.divf %20, %21 : vector<8x128xf32>
    %23 = math.tanh %17 : vector<8x128xf32>
    %24 = vector.extract_strided_slice %22 {offsets = [0, 0], sizes = [8, 32], strides = [1, 1]} : vector<8x128xf32> to vector<8x32xf32>
    %25 = vector.extract_strided_slice %22 {offsets = [0, 32], sizes = [8, 32], strides = [1, 1]} : vector<8x128xf32> to vector<8x32xf32>
    %26 = vector.extract_strided_slice %23 {offsets = [0, 64], sizes = [8, 32], strides = [1, 1]} : vector<8x128xf32> to vector<8x32xf32>
    %27 = vector.extract_strided_slice %22 {offsets = [0, 96], sizes = [8, 32], strides = [1, 1]} : vector<8x128xf32> to vector<8x32xf32>
    %28 = arith.mulf %25, %13 : vector<8x32xf32>
    %29 = arith.mulf %24, %26 : vector<8x32xf32>
    %30 = arith.addf %28, %29 : vector<8x32xf32>
    %31 = math.tanh %30 : vector<8x32xf32>
    %32 = arith.mulf %27, %31 : vector<8x32xf32>
    %c0_15 = arith.constant 0 : index
    %c0_16 = arith.constant 0 : index
    %33 = vector.load %arg4[%c0_15, %c0_16] : memref<64x128xf32, #tpu.memory_space<vmem>>, vector<64x128xf32>
    %c0_17 = arith.constant 0 : index
    %c0_18 = arith.constant 0 : index
    %34 = vector.load %arg5[%c0_17, %c0_18] : memref<1x128xf32, #tpu.memory_space<vmem>>, vector<1x128xf32>
    %c1 = arith.constant 1 : index
    %c0_19 = arith.constant 0 : index
    %c0_20 = arith.constant 0 : index
    %35 = vector.load %arg6[%c1, %c0_19, %c0_20] : memref<2x8x32xf32, #tpu.memory_space<vmem>>, vector<1x8x32xf32>
    %36 = vector.shape_cast %35 : vector<1x8x32xf32> to vector<8x32xf32>
    %c1_21 = arith.constant 1 : index
    %c0_22 = arith.constant 0 : index
    %c0_23 = arith.constant 0 : index
    %37 = vector.load %arg7[%c1_21, %c0_22, %c0_23] : memref<2x8x32xf32, #tpu.memory_space<vmem>>, vector<1x8x32xf32>
    %38 = vector.shape_cast %37 : vector<1x8x32xf32> to vector<8x32xf32>
    %39 = tpu.concatenate %32, %36 in 1 : vector<8x32xf32>, vector<8x32xf32> -> vector<8x64xf32>
    %cst_24 = arith.constant dense<0.000000e+00> : vector<8x128xf32>
    %40 = tpu.matmul %39, %33, %cst_24 {dimension_numbers = #tpu.dot_dimension_numbers<[1], [0], [0], [1], [0, 0, 1, 1], [], []>} : vector<8x64xf32>, vector<64x128xf32>, vector<8x128xf32> -> vector<8x128xf32>
    %41 = vector.broadcast %34 : vector<1x128xf32> to vector<8x128xf32>
    %42 = arith.addf %40, %41 : vector<8x128xf32>
    %43 = arith.negf %42 : vector<8x128xf32>
    %44 = math.exp %43 : vector<8x128xf32>
    %cst_25 = arith.constant 1.000000e+00 : f32
    %45 = vector.broadcast %cst_25 : f32 to vector<8x128xf32>
    %46 = arith.addf %45, %44 : vector<8x128xf32>
    %47 = arith.divf %45, %46 : vector<8x128xf32>
    %48 = math.tanh %42 : vector<8x128xf32>
    %49 = vector.extract_strided_slice %47 {offsets = [0, 0], sizes = [8, 32], strides = [1, 1]} : vector<8x128xf32> to vector<8x32xf32>
    %50 = vector.extract_strided_slice %47 {offsets = [0, 32], sizes = [8, 32], strides = [1, 1]} : vector<8x128xf32> to vector<8x32xf32>
    %51 = vector.extract_strided_slice %48 {offsets = [0, 64], sizes = [8, 32], strides = [1, 1]} : vector<8x128xf32> to vector<8x32xf32>
    %52 = vector.extract_strided_slice %47 {offsets = [0, 96], sizes = [8, 32], strides = [1, 1]} : vector<8x128xf32> to vector<8x32xf32>
    %53 = arith.mulf %50, %38 : vector<8x32xf32>
    %54 = arith.mulf %49, %51 : vector<8x32xf32>
    %55 = arith.addf %53, %54 : vector<8x32xf32>
    %56 = math.tanh %55 : vector<8x32xf32>
    %57 = arith.mulf %52, %56 : vector<8x32xf32>
    %58 = tpu.concatenate %32, %57, %30, %55 in 1 : vector<8x32xf32>, vector<8x32xf32>, vector<8x32xf32>, vector<8x32xf32> -> vector<8x128xf32>
    %c0_26 = arith.constant 0 : index
    %c0_27 = arith.constant 0 : index
    %59 = vector.load %arg11[%c0_26, %c0_27] : memref<8x128xf32, #tpu.memory_space<vmem>>, vector<8x128xf32>
    tpu.vector_store %arg11[%c0_26, %c0_27], %58 {strides = array<i32>} : memref<8x128xf32, #tpu.memory_space<vmem>>, vector<8x128xf32>,
    %c0_28 = arith.constant 0 : index
    %c0_29 = arith.constant 0 : index
    %60 = vector.load %arg8[%c0_28, %c0_29] : memref<32x64xf32, #tpu.memory_space<vmem>>, vector<32x64xf32>
    %cst_30 = arith.constant dense<0.000000e+00> : vector<8x64xf32>
    %61 = tpu.matmul %57, %60, %cst_30 {dimension_numbers = #tpu.dot_dimension_numbers<[1], [0], [0], [1], [0, 0, 1, 1], [], []>} : vector<8x32xf32>, vector<32x64xf32>, vector<8x64xf32> -> vector<8x64xf32>
    %c0_31 = arith.constant 0 : index
    %c0_32 = arith.constant 0 : index
    %62 = vector.load %arg9[%c0_31, %c0_32] : memref<1x64xf32, #tpu.memory_space<vmem>>, vector<1x64xf32>
    %63 = vector.broadcast %62 : vector<1x64xf32> to vector<8x64xf32>
    %64 = arith.addf %61, %63 : vector<8x64xf32>
    %c0_33 = arith.constant 0 : index
    %c0_34 = arith.constant 0 : index
    %65 = vector.load %arg10[%c0_33, %c0_34] : memref<8x64xf32, #tpu.memory_space<vmem>>, vector<8x64xf32>
    tpu.vector_store %arg10[%c0_33, %c0_34], %64 {strides = array<i32>} : memref<8x64xf32, #tpu.memory_space<vmem>>, vector<8x64xf32>,
    return
  }
}

</mosaic_0001>

<bundles_post_ra>
// kernel: decoder_forward.1
= control target key start
LH: loop header
LB: loop body
LE: loop exit
PB: predicated region body
PF: predicated region fallthrough
CT: control target
= control target key end

     0   :  { %17 = vsyncpa [#allocation3], 0  ;;  %s695_s0 = inlined_call_operand.vmem [shape: s32[8,1], index: 0, kind: input, shape index: {}]   ;;  %s696_s1 = inlined_call_operand.vmem [shape: f32[64,32], index: 1, kind: input, shape index: {}]   ;;  %s697_s2 = inlined_call_operand.vmem [shape: f32[64,128], index: 2, kind: input, shape index: {}]   ;;  %s698_s3 = inlined_call_operand.vmem [shape: f32[1,128], index: 3, kind: input, shape index: {}]   ;;  %s699_s4 = inlined_call_operand.hbm [shape: f32[64,128], index: 4, kind: input, shape index: {}]   ;;  %s700_s5 = inlined_call_operand.vmem [shape: f32[1,128], index: 5, kind: input, shape index: {}]   ;;  %s701_s6 = inlined_call_operand.hbm [shape: f32[2,8,32], index: 6, kind: input, shape index: {}]   ;;  %s702_s7 = inlined_call_operand.hbm [shape: f32[2,8,32], index: 7, kind: input, shape index: {}]   ;;  %s703_s8 = inlined_call_operand.vmem [shape: f32[32,64], index: 8, kind: input, shape index: {}]   ;;  %s704_s9 = inlined_call_operand.vmem [shape: f32[1,64], index: 9, kind: input, shape index: {}]   ;;  %s705_s10 = inlined_call_operand.hbm [shape: f32[8,64], index: 10, kind: output, shape index: {0}]   ;;  %s706_s11 = inlined_call_operand.vmem [shape: f32[8,128], index: 11, kind: output, shape index: {1}]  }
   0x1   :  { %18 = vsyncpa [#allocation6], 0 }
   0x2   :  { %19 = vsyncpa [#allocation4], 0  ;;  %s47_s19 = sshll.u32 %s701_s6, 4  ;;  %s510_s20 = smov [#allocation5]   ;;  %s48_s19 = int_to_ptr.hbm [resolvable:$true] %s47_s19 }
   0x3   :  { %s49_s21 = sshll.u32 %s510_s20, 4  ;;  %s32_s24 = sshll.u32 %s699_s4, 4  ;;  %s50_s21 = int_to_ptr.vmem [resolvable:$true] %s49_s21  ;;  %s33_s24 = int_to_ptr.hbm [resolvable:$true] %s32_s24 }
   0x4   :  { %s511_s25 = smov 128   ;;  %s512_s26 = smov 8  }
   0x5   :  { %55 = dma.hbm_to_vmem [thread:$0]  %s48_s19, 256, %s50_s21, [#allocation6], %s511_s25, %s511_s25, %s512_s26  }
   0x6   :  { %s513_s27 = smov [#allocation2]   ;;  %s60_s12 = sshll.u32 %s702_s7, 4  ;;  %s61_s12 = int_to_ptr.hbm [resolvable:$true] %s60_s12 }
   0x7   :  { %s34_s28 = sshll.u32 %s513_s27, 4  ;;  %s514_s6 = smov [#allocation7]   ;;  %s35_s28 = int_to_ptr.vmem [resolvable:$true] %s34_s28 }
   0x8   :  { %40 = dma.hbm_to_vmem [thread:$0]  %s33_s24, 1024, %s35_s28, [#allocation3], %s511_s25, %s511_s25, %s512_s26  }
   0x9   :  { %s62_s13 = sshll.u32 %s514_s6, 4  ;;  %s63_s13 = int_to_ptr.vmem [resolvable:$true] %s62_s13 }
   0xa   :  { %68 = dma.hbm_to_vmem [thread:$0]  %s61_s12, 256, %s63_s13, [#allocation6], %s511_s25, %s511_s25, %s512_s26  }
   0xb   :  { %504 = dma.done.wait [#allocation3], 1024  }
   0xc   :  { %505 = vsyncadd [#allocation3], 4294966272 }
   0xd   :  { %506 = dma.done.wait [#allocation6], 512  }
   0xe   :  { %507 = vsyncadd [#allocation6], 4294966784  ;;  %v515_v0 = vmov 0   ;;  %v85_v1 = vld [vmem:[%s695_s0] sm:$0xff]  ;;  %v101_v2 = vld [vmem:[%s696_s1 + $0x38] sm:$0xff]  ;;  %s516_s13 = smov 32   ;;  %v86_v18 = vlaneseq }
   0xf   :  { %388 = vset.pattern.permute.xlu0 %v515_v0  ;;  %v100_v3 = vld [vmem:[%s696_s1 + $0x30] sm:$0xff]  ;;  %114 = vmatpush.msra.mxu0 %v101_v2  ;;  %v99_v4 = vld [vmem:[%s696_s1 + $0x28] sm:$0xff]  ;;  %v98_v5 = vld [vmem:[%s696_s1 + $0x20] sm:$0xff]  ;;  %vm102_vm0 = vcmask 523264   ;;  %v517_v21 = vmov 0.0   ;;  %vm141_vm2 = vcmask 261120  }
  0x10   :  { %89 = vperm.xlu0 %388, %v85_v1   ;;  %v97_v6 = vld [vmem:[%s696_s1 + $0x18] sm:$0xff]  ;;  %v96_v7 = vld [vmem:[%s696_s1 + $0x10] sm:$0xff]  ;;  %v95_v8 = vld [vmem:[%s696_s1 + $0x8] sm:$0xff]  ;;  %v87_v19 = vand.u32 127, %v86_v18  ;;  %s518_s24 = smov 64   ;;  %vm313_vm11 = vcmask 785408  }
  0x11   :  { %115 = vmatpush.msra.mxu0 %v100_v3  ;;  %v94_v9 = vld [vmem:[%s696_s1] sm:$0xff]  ;;  %v133_v11 = vld [vmem:[%s697_s2 + $0x38] sm:$0xff]  ;;  %v132_v12 = vld [vmem:[%s697_s2 + $0x30] sm:$0xff]  ;;  %s519_s14 = smov [#allocation8]   ;;  %s356_s7 = sshll.u32 %s705_s10, 4  ;;  %s357_s7 = int_to_ptr.hbm [resolvable:$true] %s356_s7 }
  0x12   :  { %v135_v10 = vld [vmem:[#allocation5] sm:$0xff]  ;;  %157 = vmatpush.msra.mxu1 %v133_v11  ;;  %v131_v13 = vld [vmem:[%s697_s2 + $0x28] sm:$0xff]  ;;  %v129_v15 = vld [vmem:[%s697_s2 + $0x18] sm:$0xff]  ;;  %s354_s1 = sshll.u32 %s519_s14, 4  ;;  %s355_s1 = int_to_ptr.vmem [resolvable:$true] %s354_s1 }
  0x13   :  { %116 = vmatpush.msra.mxu0 %v99_v4  ;;  %v130_v14 = vld [vmem:[%s697_s2 + $0x20] sm:$0xff]  ;;  %v128_v16 = vld [vmem:[%s697_s2 + $0x10] sm:$0xff]  ;;  %v127_v17 = vld [vmem:[%s697_s2 + $0x8] sm:$0xff] }
  0x14   :  { %158 = vmatpush.msra.mxu1 %v132_v12  ;;  %v126_v23 = vld [vmem:[%s697_s2] sm:$0xff]  ;;  %v136_v31 = vld [vmem:[#allocation7] sm:$0xff]  ;;  %v220_v52 = vld [vmem:[#allocation5 + $0x8] sm:$0xff] }
  0x15   :  { %117 = vmatpush.msra.mxu0 %v98_v5  ;;  %v389_v27 = vld [vmem:[%s698_s3] ss:$0 sm:$0xff]  ;;  %v217_v53 = vld [vmem:[#allocation2 + $0x38] sm:$0xff]  ;;  %v216_v54 = vld [vmem:[#allocation2 + $0x30] sm:$0xff] }
  0x16   :  { %159 = vmatpush.msra.mxu1 %v131_v13  ;;  %246 = vmatpush.msra.mxu2 %v217_v53  ;;  %v215_v55 = vld [vmem:[#allocation2 + $0x28] sm:$0xff]  ;;  %v214_v56 = vld [vmem:[#allocation2 + $0x20] sm:$0xff]  ;;  %v213_v57 = vld [vmem:[#allocation2 + $0x18] sm:$0xff] }
  0x17   :  { %118 = vmatpush.msra.mxu0 %v97_v6  ;;  %v212_v58 = vld [vmem:[#allocation2 + $0x10] sm:$0xff]  ;;  %v211_v59 = vld [vmem:[#allocation2 + $0x8] sm:$0xff]  ;;  %v210_v62 = vld [vmem:[#allocation2] sm:$0xff] }
  0x18   :  { %138 = vrot.lane.b32.xlu0 %v135_v10, %s516_s13  ;;  %160 = vmatpush.msra.mxu1 %v130_v14  ;;  %v222_v63 = vld [vmem:[#allocation7 + $0x8] sm:$0xff]  ;;  %v390_v3 = vld [vmem:[%s700_s5] ss:$0 sm:$0xff] }
  0x19   :  { %119 = vmatpush.msra.mxu0 %v96_v7  ;;  %247 = vmatpush.msra.mxu2 %v216_v54 }
  0x1a   :  { %161 = vmatpush.msra.mxu1 %v129_v15 }
  0x1b   :  { %120 = vmatpush.msra.mxu0 %v95_v8  ;;  %248 = vmatpush.msra.mxu2 %v215_v55 }
  0x1c   :  { %162 = vmatpush.msra.mxu1 %v128_v16 }
  0x1d   :  { %121 = vmatpush.msra.mxu0 %v94_v9  ;;  %249 = vmatpush.msra.mxu2 %v214_v56 }
  0x1e   :  { %163 = vmatpush.msra.mxu1 %v127_v17 }
  0x1f   :  { %250 = vmatpush.msra.mxu2 %v213_v57 }
  0x20   :  { %164 = vmatpush.msra.mxu1 %v126_v23 }
  0x21   :  { %251 = vmatpush.msra.mxu2 %v212_v58 }
  0x23   :  { %252 = vmatpush.msra.mxu2 %v211_v59 }
  0x25   :  { %253 = vmatpush.msra.mxu2 %v210_v62 }
  0x82   :  { %v90_v20 = vpop.permute.xlu0 %89 }
  0x83   :  { %vm91_vm1 = vcmp.eq.s32.totalorder %v87_v19, %v90_v20 }
  0x84   :  { %v371_v22 = vsel %vm91_vm1, 1.0, %v517_v21 }
  0x85   :  { %372 = vmatmul.msk.f32.vlgmr.msra.gmra.mxu0 %vm102_vm0, %v371_v22 }
  0x8a   :  { %v139_v24 = vpop.permute.xlu0 %138 }
 0x102   :  { %v123_v25 = vpop.f32.mrf.mxu0 }
 0x103   :  { %v142_v26 = vsel %vm141_vm2, %v123_v25, %v139_v24 }
 0x104   :  { %373 = vmatmul.msk.f32.vlgmr.msra.gmra.mxu1 %vm102_vm0, %v142_v26 }
 0x181   :  { %v166_v28 = vpop.f32.mrf.mxu1 }
 0x182   :  { %v167_v29 = vadd.f32 %v389_v27, %v166_v28  ;;  %v319_v27 = vld [vmem:[%s703_s8 + $0x18] sm:$0xff]  ;;  %v318_v28 = vld [vmem:[%s703_s8 + $0x10] sm:$0xff] }
 0x183   :  { %340 = vmatpush.msra.mxu3 %v319_v27 }
 0x184   :  { %392 = vtanh.f32 %v167_v29  ;;  %v374_v32 = vmul.f32 -1.442695, %v167_v29  ;;  %v317_v29 = vld [vmem:[%s703_s8 + $0x8] sm:$0xff] }
 0x185   :  { %341 = vmatpush.msra.mxu3 %v318_v28 }
 0x186   :  { %394 = vpow2.f32 %v374_v32 }
 0x187   :  { %342 = vmatpush.msra.mxu3 %v317_v29 }
 0x18a   :  { %v393_v30 = vpop.eup %392 }
 0x18b   :  { %195 = vrot.lane.b32.xlu1 %v393_v30, %s518_s24  ;;  %v316_v30 = vld [vmem:[%s703_s8] sm:$0xff] }
 0x18c   :  { %v395_v33 = vpop.eup %394  ;;  %343 = vmatpush.msra.mxu3 %v316_v30 }
 0x18d   :  { %v172_v34 = vadd.f32 1.0, %v395_v33 }
 0x18f   :  { %396 = vrcp.f32 %v172_v34  ;;  %v184_v40 = vand.u32 2147483648, %v172_v34  ;;  %vm178_vm4 = vweird.f32 %v172_v34  ;;  %v182_v41 = vand.u32 2147483647, %v172_v34 }
 0x191   :  { %v185_v43 = vor.u32 1.1754944e-38, %v184_v40  ;;  %vm183_vm6 = vcmp.eq.f32.partialorder %v182_v41, 8.507059e+37  ;;  %v391_v40 = vld [vmem:[%s704_s9] ss:$0 sm:$0xff] }
 0x193   :  { %190 = vrot.lane.b32.xlu1 %v136_v31, %s516_s13 }
 0x195   :  { %v397_v35 = vpop.eup %396 }
 0x196   :  { %v174_v36 = vmul.f32 %v397_v35, %v172_v34  ;;  %vm179_vm3 = vweird.f32 %v397_v35 }
 0x197   :  { %vm180_vm5 = vmor %vm178_vm4, %vm179_vm3 }
 0x198   :  { %v175_v37 = vsub.f32 1.0, %v174_v36 }
 0x19a   :  { %v176_v38 = vmul.f32 %v397_v35, %v175_v37 }
 0x19b   :  { %228 = vrot.lane.b32.xlu1 %v220_v52, %s516_s13 }
 0x19c   :  { %v177_v39 = vadd.f32 %v397_v35, %v176_v38 }
 0x19e   :  { %v181_v42 = vsel %vm180_vm5, %v397_v35, %v177_v39 }
 0x19f   :  { %v186_v45 = vsel %vm183_vm6, %v185_v43, %v181_v42 }
 0x1fd   :  { %v196_v44 = vpop.permute.xlu1 %195 }
 0x1fe   :  { %v198_v46 = vmul.f32 %v196_v44, %v186_v45 }
 0x200   :  { %200 = vrot.lane.b32.xlu2 %v198_v46, %s516_s13 }
 0x205   :  { %v191_v47 = vpop.permute.xlu1 %190 }
 0x206   :  { %v193_v48 = vmul.f32 %v191_v47, %v186_v45 }
 0x20d   :  { %v229_v0 = vpop.permute.xlu1 %228 }
 0x25a   :  { %v201_v49 = vpop.permute.xlu2 %200 }
 0x25b   :  { %v650_v50 = vadd.f32 %v201_v49, %v193_v48 }
 0x25d   :  { %398 = vtanh.f32 %v650_v50 }
 0x263   :  { %v399_v51 = vpop.eup %398 }
 0x264   :  { %206 = vrot.lane.b32.xlu2 %v399_v51, %s518_s24 }
 0x2be   :  { %v207_v60 = vpop.permute.xlu2 %206 }
 0x2bf   :  { %v209_v61 = vmul.f32 %v207_v60, %v186_v45 }
 0x2c1   :  { %224 = vrot.lane.b32.xlu0 %v209_v61, %s516_s13 }
 0x2c9   :  { %279 = vrot.lane.b32.xlu0 %v222_v63, %s516_s13 }
 0x333   :  { %v225_v1 = vpop.permute.xlu0 %224 }
 0x334   :  { %v231_v2 = vsel %vm141_vm2, %v225_v1, %v229_v0 }
 0x335   :  { %375 = vmatmul.msk.f32.vlgmr.msra.gmra.mxu2 %vm102_vm0, %v231_v2 }
 0x33b   :  { %v280_v22 = vpop.permute.xlu0 %279 }
 0x3b8   :  { %v255_v4 = vpop.f32.mrf.mxu2 }
 0x3b9   :  { %v256_v5 = vadd.f32 %v390_v3, %v255_v4 }
 0x3bb   :  { %400 = vtanh.f32 %v256_v5  ;;  %v376_v7 = vmul.f32 -1.442695, %v256_v5 }
 0x3bd   :  { %402 = vpow2.f32 %v376_v7 }
 0x3c1   :  { %v401_v6 = vpop.eup %400 }
 0x3c2   :  { %284 = vrot.lane.b32.xlu2 %v401_v6, %s518_s24 }
 0x3c3   :  { %v403_v8 = vpop.eup %402 }
 0x3c4   :  { %v261_v9 = vadd.f32 1.0, %v403_v8 }
 0x3c6   :  { %404 = vrcp.f32 %v261_v9  ;;  %v273_v15 = vand.u32 2147483648, %v261_v9  ;;  %vm267_vm8 = vweird.f32 %v261_v9  ;;  %v271_v16 = vand.u32 2147483647, %v261_v9 }
 0x3c8   :  { %v274_v18 = vor.u32 1.1754944e-38, %v273_v15  ;;  %vm272_vm10 = vcmp.eq.f32.partialorder %v271_v16, 8.507059e+37 }
 0x3cc   :  { %v405_v10 = vpop.eup %404 }
 0x3cd   :  { %v263_v11 = vmul.f32 %v405_v10, %v261_v9  ;;  %vm268_vm7 = vweird.f32 %v405_v10 }
 0x3ce   :  { %vm269_vm9 = vmor %vm267_vm8, %vm268_vm7 }
 0x3cf   :  { %v264_v12 = vsub.f32 1.0, %v263_v11 }
 0x3d1   :  { %v265_v13 = vmul.f32 %v405_v10, %v264_v12 }
 0x3d3   :  { %v266_v14 = vadd.f32 %v405_v10, %v265_v13 }
 0x3d5   :  { %v270_v17 = vsel %vm269_vm9, %v405_v10, %v266_v14 }
 0x3d6   :  { %v275_v19 = vsel %vm272_vm10, %v274_v18, %v270_v17 }
 0x3d7   :  { %v282_v23 = vmul.f32 %v280_v22, %v275_v19 }
 0x41c   :  { %v285_v20 = vpop.permute.xlu2 %284 }
 0x41d   :  { %v287_v21 = vmul.f32 %v285_v20, %v275_v19 }
 0x41f   :  { %289 = vrot.lane.b32.xlu1 %v287_v21, %s516_s13 }
 0x491   :  { %v290_v24 = vpop.permute.xlu1 %289 }
 0x492   :  { %v292_v25 = vadd.f32 %v290_v24, %v282_v23 }
 0x494   :  { %406 = vtanh.f32 %v292_v25 }
 0x49a   :  { %v407_v26 = vpop.eup %406 }
 0x49b   :  { %295 = vrot.lane.b32.xlu2 %v407_v26, %s518_s24 }
 0x4a3   :  { %304 = vrot.lane.b32.xlu2 %v650_v50, %s516_s13 }
 0x4f5   :  { %v296_v31 = vpop.permute.xlu2 %295 }
 0x4f6   :  { %v298_v32 = vmul.f32 %v296_v31, %v275_v19 }
 0x4f8   :  { %300 = vrot.lane.b32.xlu1 %v298_v32, %s518_s24  ;;  %324 = vrot.lane.b32.xlu0 %v298_v32, %s516_s13 }
 0x4fd   :  { %v305_v36 = vpop.permute.xlu2 %304 }
 0x500   :  { %308 = vrot.lane.b32.xlu0 %v292_v25, %s518_s24 }
 0x56a   :  { %v325_v33 = vpop.permute.xlu0 %324  ;;  %v301_v34 = vpop.permute.xlu1 %300 }
 0x56b   :  { %377 = vmatmul.msk.f32.vlgmr.msra.gmra.mxu3 %vm141_vm2, %v325_v33  ;;  %v311_v35 = vsel %vm141_vm2, %v225_v1, %v301_v34 }
 0x56c   :  { %v312_v38 = vsel %vm102_vm0, %v311_v35, %v305_v36 }
 0x572   :  { %v309_v37 = vpop.permute.xlu0 %308 }
 0x573   :  { %v314_v39 = vsel %vm313_vm11, %v312_v38, %v309_v37 }
 0x574   :  { %315 = vst [vmem:[%s706_s11] sm:$0xff] %v314_v39 }
 0x5ee   :  { %v345_v41 = vpop.f32.mrf.mxu3 }
 0x5ef   :  { %v346_v42 = vadd.f32 %v391_v40, %v345_v41 }
 0x5f1   :  { %348 = vst.msk [vmem:[#allocation8] sm:$0xff] %vm102_vm0, %v346_v42 }
 0x5f2   :  { %359 = dma.vmem_to_hbm [thread:$0]  %s355_s1, 128, %s357_s7, [#allocation4]  }
 0x5f3   :  { %508 = dma.done.wait [#allocation4], 128  }
 0x5f4   :  { %509 = vsyncadd [#allocation4], 4294967168 }
 0x5f5   :  { %368 = vsyncpa [#allocation3], 1 }
 0x5f6   :  { %369 = vsyncpa [#allocation6], 1 }
 0x5f7   :  { %370 = vsyncpa [#allocation4], 1 }

</bundles_post_ra>
